<compile_context>
chip_gen: v6e
topology: v6e:2x2x1
jax: 0.10.0
libtpu: 0.0.40
codegen_flags: <defaults>
</compile_context>

<pallas_src>
import numpy as np
import jax
import jax.numpy as jnp
from jax.experimental import pallas as pl
from jax.experimental.pallas import tpu as pltpu


# ----------------------------- kernels ------------------------------------


def _bone_align_vpu_kernel(pts_ref, m_ref, bias_ref, out_ref):
    # pts_ref:  (TN, 3)   points tile
    # m_ref:    (3, L)    fused affine matrix, packed lanes (channel j*3+r)
    # bias_ref: (1, L)    fused translation
    # out_ref:  (TN, L)
    p = pts_ref[...]
    m = m_ref[...]
    acc = (p[:, 0:1] * m[0:1, :]
           + p[:, 1:2] * m[1:2, :]
           + p[:, 2:3] * m[2:3, :]
           + bias_ref[...])
    out_ref[...] = acc.astype(out_ref.dtype)


def _bone_align_mxu_kernel(pts_ref, m_ref, bias_ref, out_ref):
    # v7x-oriented variant: push the K=3 contraction to the (otherwise idle)
    # MXU slot; precision pinned so f32 accuracy is preserved.
    acc = jnp.dot(pts_ref[...], m_ref[...],
                  preferred_element_type=jnp.float32,
                  precision=jax.lax.Precision.HIGHEST) + bias_ref[...]
    out_ref[...] = acc.astype(out_ref.dtype)


# ----------------------------- wrapper -------------------------------------


def _choose_tile_n(n):
    # Aim for >= ~8 grid steps for large N (so both v7x TensorCores get several
    # tiles), tile in [128, 4096].  4096 keeps the double-buffered pipeline
    # footprint (~8 MiB, lane-padded) under v5e's 16 MiB scoped-VMEM default.
    return int(min(4096, max(128, pl.next_power_of_2(pl.cdiv(int(n), 8)))))


def bone_align_embedder_forward(pts, w2l, transforms, rigid_idxs=None,
                                tile_n=None, out_dtype=jnp.float32,
                                return_padded=False, use_mxu=False):
    """Pallas implementation of BoneAlignEmbedder.forward.

    pts:        (N, 3) world-space points
    w2l:        (J, 4, 4) world-to-local transforms
    transforms: (J, 4, 4) bone-align transforms (the registered buffer)
    returns     (N, J_sel, 3); if return_padded, the (N, Lpad) lane-dense slab
                with channel j*3+r (r<3) and zero padding lanes.
    """
    if rigid_idxs is not None:
        w2l = w2l[rigid_idxs]
        transforms = transforms[rigid_idxs]

    pts = pts.astype(jnp.float32)
    w2l = w2l.astype(jnp.float32)
    transforms = transforms.astype(jnp.float32)

    N = pts.shape[0]
    J = w2l.shape[0]
    J3 = J * 3
    L = ((J3 + 127) // 128) * 128 if return_padded else J3

    # ---- Fuse the two affine stages in the wrapper (tiny J x 3 x 4 math) ----
    #   A_j = transforms[j, :3, :3] @ w2l[j, :3, :]                       (3, 4)
    #   out[n, j, r] = sum_c pts[n, c] * A[j, r, c] + (A[j, r, 3] + t[j, r])
    A = jnp.einsum('jrk,jkc->jrc', transforms[:, :3, :3], w2l[:, :3, :])   # (J, 3, 4)
    M3 = jnp.transpose(A[:, :, :3], (2, 0, 1)).reshape(3, J3)              # M3[c, j*3+r]
    bias = (A[:, :, 3] + transforms[:, :3, 3]).reshape(1, J3)              # bias[0, j*3+r]
    if L != J3:
        M3 = jnp.zeros((3, L), jnp.float32).at[:, :J3].set(M3)
        bias = jnp.zeros((1, L), jnp.float32).at[:, :J3].set(bias)

    # ---- Tile the point axis (partial edge block handled by Pallas) ----
    if tile_n is None:
        tile_n = _choose_tile_n(N)
    else:
        tile_n = max(8, min(int(tile_n), 4096))
        tile_n = -(-tile_n // 8) * 8          # sublane-aligned

    kernel = _bone_align_mxu_kernel if use_mxu else _bone_align_vpu_kernel

    out = pl.pallas_call(
        kernel,
        out_shape=jax.ShapeDtypeStruct((N, L), out_dtype),
        grid_spec=pltpu.PrefetchScalarGridSpec(
            num_scalar_prefetch=0,
            grid=(pl.cdiv(N, tile_n),),
            in_specs=[
                pl.BlockSpec((tile_n, 3), lambda i: (i, 0)),
                pl.BlockSpec((3, L), lambda i: (0, 0)),
                pl.BlockSpec((1, L), lambda i: (0, 0)),
            ],
            out_specs=pl.BlockSpec((tile_n, L), lambda i: (i, 0)),
        ),
        compiler_params=pltpu.CompilerParams(dimension_semantics=("parallel",)),
    )(pts, M3, bias)

    if return_padded:
        return out
    return out.reshape(N, J, 3)


# ----------------------------- reference -----------------------------------


def reference_forward(pts, w2l, transforms, rigid_idxs=None):
    """Pure-JAX reference matching the PyTorch module."""
    if rigid_idxs is not None:
        w2l = w2l[rigid_idxs]
        transforms = transforms[rigid_idxs]
    ph = jnp.concatenate([pts, jnp.ones_like(pts[..., :1])], axis=-1)     # (N, 4)
    pts_jt = jnp.einsum('jkc,nc->njk', w2l, ph)[..., :3]                  # (N, J, 3)
    out = (jnp.einsum('jrk,njk->njr', transforms[:, :3, :3], pts_jt)
           + transforms[None, :, :3, 3])
    return out


def _random_rigid_transforms(key, n):
    """Deterministic synthetic rigid transforms (rotation via QR + small translation)."""
    k1, k2 = jax.random.split(key)
    m = jax.random.normal(k1, (n, 3, 3), dtype=jnp.float32)
    q, _ = jnp.linalg.qr(m)
    t = jax.random.normal(k2, (n, 3), dtype=jnp.float32) * 0.1
    T = (jnp.zeros((n, 4, 4), jnp.float32)
         .at[:, :3, :3].set(q)
         .at[:, :3, 3].set(t)
         .at[:, 3, 3].set(1.0))
    return T


if __name__ == "__main__":
    key = jax.random.PRNGKey(0)
    k_pts, k_rest, k_w2l, k_align = jax.random.split(key, 4)

    N = 300          # not a multiple of the tile -> exercises the masked edge block
    J = 24           # SMPL skeleton joint count

    rest_pose = jax.random.normal(k_rest, (J, 3), dtype=jnp.float32)  # kept for API parity
    # TODO(synk): get_bone_align_transforms / SMPLSkeleton not reproduced; the `transforms`
    # buffer is synthesized deterministically instead of being derived from rest_pose.
    transforms = _random_rigid_transforms(k_align, J)   # module buffer self.transforms
    w2l = _random_rigid_transforms(k_w2l, J)            # per-joint world-to-local input
    pts = jax.random.normal(k_pts, (N, 3), dtype=jnp.float32)

    # Full-joint path (packed output).
    out = jax.block_until_ready(bone_align_embedder_forward(pts, w2l, transforms))
    ref = jax.block_until_ready(reference_forward(pts, w2l, transforms))
    assert out.shape == (N, J, 3), out.shape
    assert np.allclose(np.asarray(out), np.asarray(ref), atol=1e-4, rtol=1e-4), (
        "mismatch vs reference (full)")

    # rigid_idxs path.
    rigid_idxs = jnp.array([0, 3, 7, 11, 15, 19, 23], dtype=jnp.int32)
    out_r = jax.block_until_ready(
        bone_align_embedder_forward(pts, w2l, transforms, rigid_idxs=rigid_idxs))
    ref_r = jax.block_until_ready(
        reference_forward(pts, w2l, transforms, rigid_idxs=rigid_idxs))
    assert out_r.shape == (N, rigid_idxs.shape[0], 3), out_r.shape
    assert np.allclose(np.asarray(out_r), np.asarray(ref_r), atol=1e-4, rtol=1e-4), (
        "mismatch vs reference (rigid_idxs)")

    # Lane-padded slab path (padded lanes must be exactly zero, no junk rows).
    out_pad = jax.block_until_ready(
        bone_align_embedder_forward(pts, w2l, transforms, return_padded=True))
    assert out_pad.shape == (N, 128), out_pad.shape
    assert np.allclose(np.asarray(out_pad[:, :J * 3]).reshape(N, J, 3),
                       np.asarray(ref), atol=1e-4, rtol=1e-4), (
        "mismatch vs reference (padded slab)")
    assert np.all(np.asarray(out_pad[:, J * 3:]) == 0.0), "padding lanes not zero"

    print("KERNEL_OK")
</pallas_src>

<mosaic_0001>
module attributes {stable_mosaic.version = 11 : i64} {
  func.func @_bone_align_vpu_kernel(%arg0: i32, %arg1: memref<128x3xf32, #tpu.memory_space<vmem>>, %arg2: memref<3x72xf32, #tpu.memory_space<vmem>>, %arg3: memref<1x72xf32, #tpu.memory_space<vmem>>, %arg4: memref<128x72xf32, #tpu.memory_space<vmem>>) attributes {dimension_semantics = [#tpu.dimension_semantics<parallel>], iteration_bounds = array<i64: 3>, scalar_prefetch = 0 : i64, scratch_operands = 0 : i64, tpu.core_type = #tpu.core_type<tc>, window_params = [{transform_indices = @transform_0, window_bounds = array<i64: 128, 3>}, {pipeline_mode = #tpu.pipeline_mode<synchronous>, transform_indices = @transform_1, window_bounds = array<i64: 3, 72>}, {pipeline_mode = #tpu.pipeline_mode<synchronous>, transform_indices = @transform_2, window_bounds = array<i64: 1, 72>}, {transform_indices = @transform_3, window_bounds = array<i64: 128, 72>}]} {
    %c0 = arith.constant 0 : index
    %c0_0 = arith.constant 0 : index
    %0 = vector.load %arg1[%c0, %c0_0] : memref<128x3xf32, #tpu.memory_space<vmem>>, vector<128x3xf32>
    %c0_1 = arith.constant 0 : index
    %c0_2 = arith.constant 0 : index
    %1 = vector.load %arg2[%c0_1, %c0_2] : memref<3x72xf32, #tpu.memory_space<vmem>>, vector<3x72xf32>
    %2 = vector.extract_strided_slice %0 {offsets = [0, 0], sizes = [128, 1], strides = [1, 1]} : vector<128x3xf32> to vector<128x1xf32>
    %3 = vector.extract_strided_slice %1 {offsets = [0, 0], sizes = [1, 72], strides = [1, 1]} : vector<3x72xf32> to vector<1x72xf32>
    %4 = vector.broadcast %2 : vector<128x1xf32> to vector<128x72xf32>
    %5 = vector.broadcast %3 : vector<1x72xf32> to vector<128x72xf32>
    %6 = arith.mulf %4, %5 : vector<128x72xf32>
    %7 = vector.extract_strided_slice %0 {offsets = [0, 1], sizes = [128, 1], strides = [1, 1]} : vector<128x3xf32> to vector<128x1xf32>
    %8 = vector.extract_strided_slice %1 {offsets = [1, 0], sizes = [1, 72], strides = [1, 1]} : vector<3x72xf32> to vector<1x72xf32>
    %9 = vector.broadcast %7 : vector<128x1xf32> to vector<128x72xf32>
    %10 = vector.broadcast %8 : vector<1x72xf32> to vector<128x72xf32>
    %11 = arith.mulf %9, %10 : vector<128x72xf32>
    %12 = arith.addf %6, %11 : vector<128x72xf32>
    %13 = vector.extract_strided_slice %0 {offsets = [0, 2], sizes = [128, 1], strides = [1, 1]} : vector<128x3xf32> to vector<128x1xf32>
    %14 = vector.extract_strided_slice %1 {offsets = [2, 0], sizes = [1, 72], strides = [1, 1]} : vector<3x72xf32> to vector<1x72xf32>
    %15 = vector.broadcast %13 : vector<128x1xf32> to vector<128x72xf32>
    %16 = vector.broadcast %14 : vector<1x72xf32> to vector<128x72xf32>
    %17 = arith.mulf %15, %16 : vector<128x72xf32>
    %18 = arith.addf %12, %17 : vector<128x72xf32>
    %c0_3 = arith.constant 0 : index
    %c0_4 = arith.constant 0 : index
    %19 = vector.load %arg3[%c0_3, %c0_4] : memref<1x72xf32, #tpu.memory_space<vmem>>, vector<1x72xf32>
    %20 = vector.broadcast %19 : vector<1x72xf32> to vector<128x72xf32>
    %21 = arith.addf %18, %20 : vector<128x72xf32>
    %c0_5 = arith.constant 0 : index
    %c0_6 = arith.constant 0 : index
    %22 = vector.load %arg4[%c0_5, %c0_6] : memref<128x72xf32, #tpu.memory_space<vmem>>, vector<128x72xf32>
    tpu.vector_store %arg4[%c0_5, %c0_6], %21 {strides = array<i32>} : memref<128x72xf32, #tpu.memory_space<vmem>>, vector<128x72xf32>,
    return
  }
  func.func @transform_0(%arg0: i32) -> (i32, i32) {
    %c0_i32 = arith.constant 0 : i32
    %c0_i32_0 = arith.constant 0 : i32
    return %arg0, %c0_i32 : i32, i32
  }
  func.func @transform_1(%arg0: i32) -> (i32, i32) {
    %c0_i32 = arith.constant 0 : i32
    %c0_i32_0 = arith.constant 0 : i32
    %c0_i32_1 = arith.constant 0 : i32
    return %c0_i32, %c0_i32_0 : i32, i32
  }
  func.func @transform_2(%arg0: i32) -> (i32, i32) {
    %c0_i32 = arith.constant 0 : i32
    %c0_i32_0 = arith.constant 0 : i32
    %c0_i32_1 = arith.constant 0 : i32
    return %c0_i32, %c0_i32_0 : i32, i32
  }
  func.func @transform_3(%arg0: i32) -> (i32, i32) {
    %c0_i32 = arith.constant 0 : i32
    %c0_i32_0 = arith.constant 0 : i32
    return %arg0, %c0_i32 : i32, i32
  }
}

</mosaic_0001>

<bundles_post_ra>
// kernel: tpu_custom_call.1
= control target key start
LH: loop header
LB: loop body
LE: loop exit
PB: predicated region body
PF: predicated region fallthrough
CT: control target
= control target key end

     0   :  { %s1061_s12 = smov 0   ;;  %s1063_s13 = smov 0   ;;  %s1371_s0 = inlined_call_operand.vmem [shape: f32[300,3], index: 0, kind: input, shape index: {}]   ;;  %s1372_s1 = inlined_call_operand.vmem [shape: f32[3,72], index: 1, kind: input, shape index: {}]   ;;  %s1373_s2 = inlined_call_operand.vmem [shape: f32[1,72], index: 2, kind: input, shape index: {}]   ;;  %s1374_s3 = inlined_call_operand.vmem [shape: f32[300,72], index: 3, kind: output, shape index: {}]  }
   0x1   :  { %s1065_s14 = smov 0  }
   0x2 LB: > { %s1074_s15 = sadd.s32 4294967295, %s1004_s14   ;;  %s1076_s16 = sadd.s32 1, %s1004_s14   ;;  %s1004_s14 = sphi %s1065_s14, %s1381_s14   ;;  %s1000_s13 = sphi %s1063_s13, %s1380_s13   ;;  %s996_s12 = sphi %s1061_s12, %s1379_s12  }
   0x3   : > { %s85_s17 = ssub.s32 %s1004_s14, %s1076_s16  ;;  %s88_s18 = sadd.s32 1, %s1000_s13 }
   0x4   : > { %p86_p0 = scmp.eq.s32.totalorder %s85_s17, 0  ;;  %p98_p1 = scmp.ne.s32.totalorder %s1000_s13, %s996_s12 }
   0x5   : > { %p99_p2 = scmp.eq.s32.totalorder %s1074_s15, 2  ;;  %p828_p3 = scmp.ge.s32.totalorder %s1004_s14, 1 }
   0x6   : > { %s1084_s19 = scalar_select %p86_p0, %s1000_s13, %s88_s18  }
   0x7   : > { %p1086_p4 = por %p99_p2, %p98_p1  ;;  %p146_p5 = scmp.lt.s32.totalorder %s1004_s14, 4 }
   0x9   : > { %p147_p6 = pnand %p828_p3, %p146_p5 }
   0xa   : > { %s1091_s21 = sshll.u32 (!%p147_p6), %s1074_s15, 4  ;;  %s170_s29 = sand.u32 (!%p147_p6), 1, %s996_s12  }
   0xb   : > { %150 = sbr.rel (%p147_p6) target bundleno = 291 (0x123), region = 32  ;;  %p178_p7 = scmp.lt.s32.totalorder (!%p147_p6), %s1091_s21, 37 }
   0xc   : > { %s829_s30 = sshll.u32 (!%p147_p6), %s170_s29, 7 }
   0xd   : > { %s1173_s6 = scalar_lea.vmem (!%p147_p6), [#allocation2], %s829_s30  }
  0x10   : > { %v1038_v0 = vmov 0   ;;  %s179_s22 = scalar_select %p178_p7, %s1091_s21, 37  ;;  %v1039_v17 = vmov 1   ;;  %v1040_v18 = vmov 2   ;;  %v289_v43 = vlaneseq  ;;  %v208_v52 = vld [vmem:[%s1372_s1] sm:$0x7] }
  0x11   : > { %945 = vset.pattern.permute.xlu1 %v1038_v0  ;;  %944 = vset.pattern.permute.xlu0 %v1038_v0  ;;  %vm532_vm0 = vcmask 588800   ;;  %s557_s7 = ssub.s32 (%p1086_p4), 38, %s1091_s21  ;;  %s850_s8 = sshll.u32 (%p1086_p4), %s1074_s15, 7 }
  0x12   : > { %s831_s23 = sshll.u32 %s179_s22, 3  ;;  %v290_v46 = vshrl.u32 %v289_v43, 7  ;;  %p558_p8 = scmp.lt.s32.totalorder (%p1086_p4), %s557_s7, 16 }
  0x13   : > { %s181_s26 = scalar_lea.vmem %s1371_s0, %s831_s23  ;;  %s1278_s11 = scalar_lea.vmem (%p1086_p4), %s1374_s3, %s850_s8  }
  0x14   : > { %v194_v1 = vld [vmem:[%s181_s26 + $0x10] sm:$0xff]  ;;  %v192_v2 = vld [vmem:[%s181_s26] sm:$0xff]  ;;  %v195_v3 = vld [vmem:[%s181_s26 + $0x18] sm:$0xff]  ;;  %v375_v49 = vsub.s32 1, %v290_v46  ;;  %v291_v53 = vsub.s32 0, %v290_v46  ;;  %v475_v55 = vsub.s32 2, %v290_v46 }
  0x15   : > { %221 = vperm.xlu1 %945, %v194_v1   ;;  %211 = vperm.xlu0 %944, %v192_v2   ;;  %v193_v4 = vld [vmem:[%s181_s26 + $0x8] sm:$0xff]  ;;  %v196_v6 = vld [vmem:[%s181_s26 + $0x20] sm:$0xff]  ;;  %v199_v7 = vld [vmem:[%s181_s26 + $0x38] sm:$0xff] }
  0x16   : > { %v197_v5 = vld [vmem:[%s181_s26 + $0x28] sm:$0xff]  ;;  %v198_v8 = vld [vmem:[%s181_s26 + $0x30] sm:$0xff]  ;;  %v200_v10 = vld [vmem:[%s181_s26 + $0x40] sm:$0xff]  ;;  %v1137_v54 = vrot.slane %v208_v52, %v375_v49  ;;  %v1143_v58 = vrot.slane %v208_v52, %v291_v53  ;;  %v1147_v61 = vrot.slane %v208_v52, %v475_v55 }
  0x17   : > { %v201_v9 = vld [vmem:[%s181_s26 + $0x48] sm:$0xff]  ;;  %v203_v11 = vld [vmem:[%s181_s26 + $0x58] sm:$0xff]  ;;  %v202_v12 = vld [vmem:[%s181_s26 + $0x50] sm:$0xff] }
  0x18   : > { %v205_v13 = vld [vmem:[%s181_s26 + $0x68] sm:$0xff]  ;;  %v204_v14 = vld [vmem:[%s181_s26 + $0x60] sm:$0xff]  ;;  %v207_v15 = vld [vmem:[%s181_s26 + $0x78] sm:$0xff] }
  0x19   : > { %226 = vperm.xlu1 %945, %v195_v3   ;;  %216 = vperm.xlu0 %944, %v193_v4   ;;  %v206_v16 = vld [vmem:[%s181_s26 + $0x70] sm:$0xff] }
  0x1d   : > { %236 = vperm.xlu1 %945, %v197_v5   ;;  %231 = vperm.xlu0 %944, %v196_v6  }
  0x21   : > { %246 = vperm.xlu1 %945, %v199_v7   ;;  %241 = vperm.xlu0 %944, %v198_v8  }
  0x25   : > { %256 = vperm.xlu1 %945, %v201_v9   ;;  %251 = vperm.xlu0 %944, %v200_v10  }
  0x29   : > { %266 = vperm.xlu1 %945, %v203_v11   ;;  %261 = vperm.xlu0 %944, %v202_v12  }
  0x2d   : > { %276 = vperm.xlu1 %945, %v205_v13   ;;  %271 = vperm.xlu0 %944, %v204_v14  }
  0x31   : > { %286 = vperm.xlu1 %945, %v207_v15   ;;  %281 = vperm.xlu0 %944, %v206_v16  }
  0x35   : > { %947 = vset.pattern.permute.xlu1 %v1039_v17  ;;  %946 = vset.pattern.permute.xlu0 %v1039_v17 }
  0x36   : > { %314 = vperm.xlu1 %947, %v193_v4   ;;  %310 = vperm.xlu0 %946, %v192_v2  }
  0x3a   : > { %318 = vperm.xlu1 %947, %v194_v1   ;;  %322 = vperm.xlu0 %946, %v195_v3  }
  0x3e   : > { %326 = vperm.xlu1 %947, %v196_v6   ;;  %330 = vperm.xlu0 %946, %v197_v5  }
  0x42   : > { %334 = vperm.xlu1 %947, %v198_v8   ;;  %338 = vperm.xlu0 %946, %v199_v7  }
  0x46   : > { %342 = vperm.xlu1 %947, %v200_v10   ;;  %346 = vperm.xlu0 %946, %v201_v9  }
  0x4a   : > { %350 = vperm.xlu1 %947, %v202_v12   ;;  %354 = vperm.xlu0 %946, %v203_v11  }
  0x4e   : > { %358 = vperm.xlu1 %947, %v204_v14   ;;  %362 = vperm.xlu0 %946, %v205_v13  }
  0x52   : > { %366 = vperm.xlu1 %947, %v206_v16   ;;  %370 = vperm.xlu0 %946, %v207_v15  }
  0x56   : > { %948 = vset.pattern.permute.xlu1 %v1040_v18  ;;  %949 = vset.pattern.permute.xlu0 %v1040_v18 }
  0x57   : > { %410 = vperm.xlu1 %948, %v192_v2   ;;  %414 = vperm.xlu0 %949, %v193_v4  }
  0x5b   : > { %418 = vperm.xlu1 %948, %v194_v1   ;;  %426 = vperm.xlu0 %949, %v196_v6  }
  0x5f   : > { %422 = vperm.xlu1 %948, %v195_v3   ;;  %434 = vperm.xlu0 %949, %v198_v8  }
  0x63   : > { %430 = vperm.xlu1 %948, %v197_v5   ;;  %442 = vperm.xlu0 %949, %v200_v10   ;;  %v1161_v10 = vld [vmem:[%s1373_s2] ss:$0 sm:$0xff] }
  0x67   : > { %438 = vperm.xlu1 %948, %v199_v7   ;;  %450 = vperm.xlu0 %949, %v202_v12  }
  0x6b   : > { %446 = vperm.xlu1 %948, %v201_v9   ;;  %458 = vperm.xlu0 %949, %v204_v14  }
  0x6f   : > { %454 = vperm.xlu1 %948, %v203_v11   ;;  %466 = vperm.xlu0 %949, %v206_v16  }
  0x73   : > { %462 = vperm.xlu1 %948, %v205_v13  }
  0x77   : > { %470 = vperm.xlu1 %948, %v207_v15  }
  0x90   : > { %v222_v19 = vpop.permute.xlu1 %221  ;;  %v212_v20 = vpop.permute.xlu0 %211 }
  0x91   : > { %v293_v62 = vmul.f32 %v1143_v58, %v212_v20  ;;  %v295_v8 = vmul.f32 %v1143_v58, %v222_v19 }
  0x94   : > { %v1098_v21 = vpop.permute.xlu1 %226  ;;  %v217_v22 = vpop.permute.xlu0 %216 }
  0x95   : > { %v294_v63 = vmul.f32 %v1143_v58, %v217_v22 }
  0x98   : > { %v1100_v23 = vpop.permute.xlu1 %236  ;;  %v232_v24 = vpop.permute.xlu0 %231 }
  0x99   : > { %v297_v9 = vmul.f32 %v1143_v58, %v232_v24 }
  0x9c   : > { %v1102_v25 = vpop.permute.xlu1 %246  ;;  %v1104_v26 = vpop.permute.xlu0 %241 }
  0xa0   : > { %v1106_v27 = vpop.permute.xlu1 %256  ;;  %v1108_v28 = vpop.permute.xlu0 %251 }
  0xa4   : > { %v1110_v29 = vpop.permute.xlu1 %266  ;;  %v1112_v30 = vpop.permute.xlu0 %261 }
  0xa8   : > { %v1114_v31 = vpop.permute.xlu1 %276  ;;  %v1116_v32 = vpop.permute.xlu0 %271 }
  0xac   : > { %v1118_v33 = vpop.permute.xlu1 %286  ;;  %v1120_v34 = vpop.permute.xlu0 %281 }
  0xb1   : > { %v315_v35 = vpop.permute.xlu1 %314  ;;  %v311_v36 = vpop.permute.xlu0 %310 }
  0xb2   : > { %v378_v59 = vmul.f32 %v1137_v54, %v315_v35  ;;  %v377_v60 = vmul.f32 %v1137_v54, %v311_v36  ;;  %v296_v35 = vmul.f32 %v1143_v58, %v1098_v21  ;;  %v299_v36 = vmul.f32 %v1143_v58, %v1104_v26 }
  0xb4   : > { %v394_v4 = vadd.f32 %v378_v59, %v294_v63  ;;  %v393_v5 = vadd.f32 %v377_v60, %v293_v62  ;;  %v298_v59 = vmul.f32 %v1143_v58, %v1100_v23  ;;  %v301_v60 = vmul.f32 %v1143_v58, %v1108_v28 }
  0xb5   : > { %v319_v37 = vpop.permute.xlu1 %318  ;;  %v323_v38 = vpop.permute.xlu0 %322 }
  0xb6   : > { %v379_v0 = vmul.f32 %v1137_v54, %v319_v37  ;;  %v380_v14 = vmul.f32 %v1137_v54, %v323_v38 }
  0xb8   : > { %v395_v13 = vadd.f32 %v379_v0, %v295_v8 }
  0xb9   : > { %v327_v39 = vpop.permute.xlu1 %326  ;;  %v331_v40 = vpop.permute.xlu0 %330 }
  0xba   : > { %v381_v1 = vmul.f32 %v1137_v54, %v327_v39  ;;  %v396_v39 = vadd.f32 %v380_v14, %v296_v35 }
  0xbc   : > { %v397_v15 = vadd.f32 %v381_v1, %v297_v9 }
  0xbd   : > { %v335_v41 = vpop.permute.xlu1 %334  ;;  %v1122_v42 = vpop.permute.xlu0 %338 }
  0xbe   : > { %v383_v16 = vmul.f32 %v1137_v54, %v335_v41  ;;  %v382_v41 = vmul.f32 %v1137_v54, %v331_v40  ;;  %v384_v63 = vmul.f32 %v1137_v54, %v1122_v42  ;;  %v303_v42 = vmul.f32 %v1143_v58, %v1112_v30 }
  0xc0   : > { %v399_v43 = vadd.f32 %v383_v16, %v299_v36  ;;  %v398_v62 = vadd.f32 %v382_v41, %v298_v59 }
  0xc1   : > { %v343_v44 = vpop.permute.xlu1 %342  ;;  %v1124_v45 = vpop.permute.xlu0 %346 }
  0xc2   : > { %v385_v21 = vmul.f32 %v1137_v54, %v343_v44  ;;  %v386_v9 = vmul.f32 %v1137_v54, %v1124_v45  ;;  %v305_v45 = vmul.f32 %v1143_v58, %v1116_v32 }
  0xc4   : > { %v401_v0 = vadd.f32 %v385_v21, %v301_v60 }
  0xc5   : > { %v1126_v47 = vpop.permute.xlu1 %350  ;;  %v1128_v48 = vpop.permute.xlu0 %354 }
  0xc6   : > { %v387_v1 = vmul.f32 %v1137_v54, %v1126_v47 }
  0xc9   : > { %v1130_v50 = vpop.permute.xlu1 %358  ;;  %v1132_v51 = vpop.permute.xlu0 %362 }
  0xca   : > { %v390_v21 = vmul.f32 %v1137_v54, %v1132_v51 }
  0xcd   : > { %v1139_v56 = vpop.permute.xlu1 %366  ;;  %v1141_v57 = vpop.permute.xlu0 %370 }
  0xd2   : > { %v411_v2 = vpop.permute.xlu1 %410  ;;  %v415_v3 = vpop.permute.xlu0 %414 }
  0xd3   : > { %v477_v6 = vmul.f32 %v1147_v61, %v411_v2  ;;  %v478_v7 = vmul.f32 %v1147_v61, %v415_v3 }
  0xd5   : > { %v493_v11 = vadd.f32 %v477_v6, %v393_v5  ;;  %v494_v12 = vadd.f32 %v478_v7, %v394_v4  ;;  %v300_v6 = vmul.f32 %v1143_v58, %v1102_v25 }
  0xd6   : > { %v419_v17 = vpop.permute.xlu1 %418  ;;  %v427_v18 = vpop.permute.xlu0 %426 }
  0xd7   : > { %v516_v19 = vadd.f32 %v1161_v10, %v493_v11  ;;  %v517_v20 = vadd.f32 %v1161_v10, %v494_v12  ;;  %v479_v22 = vmul.f32 %v1147_v61, %v419_v17  ;;  %v481_v24 = vmul.f32 %v1147_v61, %v427_v18 }
  0xd8   : > { %v400_v8 = vadd.f32 %v384_v63, %v300_v6  ;;  %v403_v11 = vadd.f32 %v387_v1, %v303_v42  ;;  %v389_v12 = vmul.f32 %v1137_v54, %v1130_v50  ;;  %v302_v17 = vmul.f32 %v1143_v58, %v1106_v27 }
  0xd9   : > { %533 = vst.msk [vmem:[%s1173_s6] sm:$0xff] %vm532_vm0, %v516_v19  ;;  %534 = vst.msk [vmem:[%s1173_s6 + $0x8] sm:$0xff] %vm532_vm0, %v517_v20  ;;  %v495_v37 = vadd.f32 %v479_v22, %v395_v13  ;;  %v497_v38 = vadd.f32 %v481_v24, %v397_v15  ;;  %v388_v20 = vmul.f32 %v1137_v54, %v1128_v48 }
  0xda   : > { %v423_v46 = vpop.permute.xlu1 %422  ;;  %v435_v26 = vpop.permute.xlu0 %434  ;;  %v402_v19 = vadd.f32 %v386_v9, %v302_v17  ;;  %v405_v22 = vadd.f32 %v389_v12, %v305_v45  ;;  %v391_v24 = vmul.f32 %v1137_v54, %v1139_v56  ;;  %v307_v48 = vmul.f32 %v1143_v58, %v1120_v34 }
  0xdb   : > { %v518_v49 = vadd.f32 %v1161_v10, %v495_v37  ;;  %v520_v52 = vadd.f32 %v1161_v10, %v497_v38  ;;  %v480_v53 = vmul.f32 %v1147_v61, %v423_v46  ;;  %v483_v55 = vmul.f32 %v1147_v61, %v435_v26 }
  0xdc   : > { %v407_v46 = vadd.f32 %v391_v24, %v307_v48 }
  0xdd   : > { %535 = vst.msk [vmem:[%s1173_s6 + $0x10] sm:$0xff] %vm532_vm0, %v518_v49  ;;  %537 = vst.msk [vmem:[%s1173_s6 + $0x20] sm:$0xff] %vm532_vm0, %v520_v52  ;;  %v496_v40 = vadd.f32 %v480_v53, %v396_v39  ;;  %v499_v44 = vadd.f32 %v483_v55, %v399_v43  ;;  %v304_v39 = vmul.f32 %v1143_v58, %v1110_v29 }
  0xde   : > { %v431_v23 = vpop.permute.xlu1 %430  ;;  %v443_v2 = vpop.permute.xlu0 %442  ;;  %v306_v55 = vmul.f32 %v1143_v58, %v1114_v31  ;;  %v308_v31 = vmul.f32 %v1143_v58, %v1118_v33 }
  0xdf   : > { %v519_v28 = vadd.f32 %v1161_v10, %v496_v40  ;;  %v522_v3 = vadd.f32 %v1161_v10, %v499_v44  ;;  %v482_v4 = vmul.f32 %v1147_v61, %v431_v23  ;;  %v485_v5 = vmul.f32 %v1147_v61, %v443_v2 }
  0xe0   : > { %v404_v43 = vadd.f32 %v388_v20, %v304_v39  ;;  %v406_v60 = vadd.f32 %v390_v21, %v306_v55  ;;  %v392_v44 = vmul.f32 %v1137_v54, %v1141_v57 }
  0xe1   : > { %536 = vst.msk [vmem:[%s1173_s6 + $0x18] sm:$0xff] %vm532_vm0, %v519_v28  ;;  %539 = vst.msk [vmem:[%s1173_s6 + $0x30] sm:$0xff] %vm532_vm0, %v522_v3  ;;  %v498_v47 = vadd.f32 %v482_v4, %v398_v62  ;;  %v501_v7 = vadd.f32 %v485_v5, %v401_v0 }
  0xe2   : > { %v439_v25 = vpop.permute.xlu1 %438  ;;  %v451_v13 = vpop.permute.xlu0 %450  ;;  %v408_v2 = vadd.f32 %v392_v44, %v308_v31 }
  0xe3   : > { %v521_v30 = vadd.f32 %v1161_v10, %v498_v47  ;;  %v524_v14 = vadd.f32 %v1161_v10, %v501_v7  ;;  %v484_v15 = vmul.f32 %v1147_v61, %v439_v25  ;;  %v487_v16 = vmul.f32 %v1147_v61, %v451_v13 }
  0xe5   : > { %538 = vst.msk [vmem:[%s1173_s6 + $0x28] sm:$0xff] %vm532_vm0, %v521_v30  ;;  %541 = vst.msk [vmem:[%s1173_s6 + $0x40] sm:$0xff] %vm532_vm0, %v524_v14  ;;  %v500_v50 = vadd.f32 %v484_v15, %v400_v8  ;;  %v503_v18 = vadd.f32 %v487_v16, %v403_v11 }
  0xe6   : > { %v447_v27 = vpop.permute.xlu1 %446  ;;  %v459_v35 = vpop.permute.xlu0 %458 }
  0xe7   : > { %v523_v32 = vadd.f32 %v1161_v10, %v500_v50  ;;  %v526_v36 = vadd.f32 %v1161_v10, %v503_v18  ;;  %v486_v37 = vmul.f32 %v1147_v61, %v447_v27  ;;  %v489_v38 = vmul.f32 %v1147_v61, %v459_v35 }
  0xe9   : > { %540 = vst.msk [vmem:[%s1173_s6 + $0x38] sm:$0xff] %vm532_vm0, %v523_v32  ;;  %543 = vst.msk [vmem:[%s1173_s6 + $0x50] sm:$0xff] %vm532_vm0, %v526_v36  ;;  %v502_v56 = vadd.f32 %v486_v37, %v402_v19  ;;  %v505_v41 = vadd.f32 %v489_v38, %v405_v22 }
  0xea   : > { %v455_v26 = vpop.permute.xlu1 %454  ;;  %v467_v49 = vpop.permute.xlu0 %466 }
  0xeb   : > { %v525_v29 = vadd.f32 %v1161_v10, %v502_v56  ;;  %v528_v52 = vadd.f32 %v1161_v10, %v505_v41  ;;  %v488_v34 = vmul.f32 %v1147_v61, %v455_v26  ;;  %v491_v53 = vmul.f32 %v1147_v61, %v467_v49 }
  0xed   : > { %542 = vst.msk [vmem:[%s1173_s6 + $0x48] sm:$0xff] %vm532_vm0, %v525_v29  ;;  %545 = vst.msk [vmem:[%s1173_s6 + $0x60] sm:$0xff] %vm532_vm0, %v528_v52  ;;  %v504_v51 = vadd.f32 %v488_v34, %v404_v43  ;;  %v507_v59 = vadd.f32 %v491_v53, %v407_v46 }
  0xee   : > { %v463_v40 = vpop.permute.xlu1 %462 }
  0xef   : > { %v527_v62 = vadd.f32 %v1161_v10, %v504_v51  ;;  %v530_v63 = vadd.f32 %v1161_v10, %v507_v59  ;;  %v490_v0 = vmul.f32 %v1147_v61, %v463_v40 }
  0xf1   : > { %544 = vst.msk [vmem:[%s1173_s6 + $0x58] sm:$0xff] %vm532_vm0, %v527_v62  ;;  %547 = vst.msk [vmem:[%s1173_s6 + $0x70] sm:$0xff] %vm532_vm0, %v530_v63  ;;  %v506_v1 = vadd.f32 %v490_v0, %v406_v60 }
  0xf2   : > { %v471_v23 = vpop.permute.xlu1 %470 }
  0xf3   : > { %v529_v28 = vadd.f32 %v1161_v10, %v506_v1  ;;  %v492_v54 = vmul.f32 %v1147_v61, %v471_v23 }
  0xf5   : > { %546 = vst.msk [vmem:[%s1173_s6 + $0x68] sm:$0xff] %vm532_vm0, %v529_v28  ;;  %v508_v57 = vadd.f32 %v492_v54, %v408_v2  ;;  %555 = sbr.rel (!%p1086_p4) target bundleno = 291 (0x123), region = 36 }
  0xf7   : > { %v531_v3 = vadd.f32 %v1161_v10, %v508_v57 }
  0xf9   : > { %548 = vst.msk [vmem:[%s1173_s6 + $0x78] sm:$0xff] %vm532_vm0, %v531_v3 }
  0xfa   : > { %s1383_s7 = smov (!%p558_p8, %s557_s7), 16 }
  0xfb   : > { %s835_s12 = sshll.u32 %s1383_s7, 7 }
  0xfc   : > { %p838_p9 = scmp.eq.s32.totalorder %s835_s12, 0 }
  0xfd   : > { %s1284_s14 = sshrl.u32 (!%p838_p9), %s1383_s7, 4 }
  0xfe   : > { %566 = sbr.rel (%p838_p9) target bundleno = 291 (0x123), region = 40  ;;  %p839_p10 = scmp.le.s32.totalorder (!%p838_p9), %s1284_s14, 0 }
 0x103   : > { %781 = sbr.rel (%p839_p10) target bundleno = 274 (0x112), region = 116  ;;  %s1376_s15 = smov (!%p839_p10), %s1278_s11 }
 0x104   : > { %s1377_s17 = smov (!%p839_p10), %s1173_s6  ;;  %s1293_s18 = smov (!%p839_p10), 0  }
 0x105   : > { %s1295_s20 = smov (!%p839_p10), 0  }
 0x108 LB: >> { %v659_v33 = vld [vmem:[%s1012_s17] sm:$0xff]  ;;  %v661_v58 = vld [vmem:[%s1012_s17 + $0x8] sm:$0xff]  ;;  %v663_v61 = vld [vmem:[%s1012_s17 + $0x10] sm:$0xff]  ;;  %s691_s21 = sadd.s32 1, %s1016_s18  ;;  %s653_s20 = sadd.s32 1, %s1020_s20   ;;  %s1020_s20 = sphi %s1295_s20, %s653_s20   ;;  %s1016_s18 = sphi %s1293_s18, %s1378_s18   ;;  %s1012_s17 = sphi %s1377_s17, %s696_s17   ;;  %s1008_s15 = sphi %s1376_s15, %s697_s15  }
 0x109   : >> { %660 = vst [vmem:[%s1008_s15] sm:$0xff] %v659_v33  ;;  %662 = vst [vmem:[%s1008_s15 + $0x8] sm:$0xff] %v661_v58  ;;  %v665_v10 = vld [vmem:[%s1012_s17 + $0x18] sm:$0xff]  ;;  %v667_v4 = vld [vmem:[%s1012_s17 + $0x20] sm:$0xff]  ;;  %p692_p11 = scmp.ge.s32.totalorder %s691_s21, %s1284_s14  ;;  %p652_p12 = scmp.ge.s32.totalorder %s653_s20, %s1284_s14 }
 0x10a   : >> { %664 = vst [vmem:[%s1008_s15 + $0x10] sm:$0xff] %v663_v61  ;;  %v669_v5 = vld [vmem:[%s1012_s17 + $0x28] sm:$0xff]  ;;  %666 = vst [vmem:[%s1008_s15 + $0x18] sm:$0xff] %v665_v10  ;;  %v671_v6 = vld [vmem:[%s1012_s17 + $0x30] sm:$0xff] }
 0x10b   : >> { %668 = vst [vmem:[%s1008_s15 + $0x20] sm:$0xff] %v667_v4  ;;  %670 = vst [vmem:[%s1008_s15 + $0x28] sm:$0xff] %v669_v5  ;;  %v673_v42 = vld [vmem:[%s1012_s17 + $0x38] sm:$0xff]  ;;  %v675_v47 = vld [vmem:[%s1012_s17 + $0x40] sm:$0xff]  ;;  %s1385_s21 = smov (%p692_p11, %s691_s21), 0 }
 0x10c   : >> { %672 = vst [vmem:[%s1008_s15 + $0x30] sm:$0xff] %v671_v6  ;;  %674 = vst [vmem:[%s1008_s15 + $0x38] sm:$0xff] %v673_v42  ;;  %v677_v7 = vld [vmem:[%s1012_s17 + $0x48] sm:$0xff]  ;;  %v679_v8 = vld [vmem:[%s1012_s17 + $0x50] sm:$0xff]  ;;  %s840_s22 = sshll.u32 %s1385_s21, 7  ;;  %s1378_s18 = smov %s1385_s21 }
 0x10d   : >> { %676 = vst [vmem:[%s1008_s15 + $0x40] sm:$0xff] %v675_v47  ;;  %v681_v9 = vld [vmem:[%s1012_s17 + $0x58] sm:$0xff]  ;;  %678 = vst [vmem:[%s1008_s15 + $0x48] sm:$0xff] %v677_v7  ;;  %v683_v11 = vld [vmem:[%s1012_s17 + $0x60] sm:$0xff]  ;;  %655 = sbr.rel (!%p652_p12) target bundleno = 264 (0x108), region = 122 }
 0x10e   : >> { %680 = vst [vmem:[%s1008_s15 + $0x50] sm:$0xff] %v679_v8  ;;  %682 = vst [vmem:[%s1008_s15 + $0x58] sm:$0xff] %v681_v9  ;;  %v685_v12 = vld [vmem:[%s1012_s17 + $0x68] sm:$0xff]  ;;  %v687_v25 = vld [vmem:[%s1012_s17 + $0x70] sm:$0xff] }
 0x10f   : >> { %684 = vst [vmem:[%s1008_s15 + $0x60] sm:$0xff] %v683_v11  ;;  %686 = vst [vmem:[%s1008_s15 + $0x68] sm:$0xff] %v685_v12  ;;  %v689_v13 = vld [vmem:[%s1012_s17 + $0x78] sm:$0xff]  ;;  %s696_s17 = scalar_lea.vmem %s1173_s6, %s840_s22 [#allocation2]  }
 0x110   : >> { %688 = vst [vmem:[%s1008_s15 + $0x70] sm:$0xff] %v687_v25  ;;  %690 = vst [vmem:[%s1008_s15 + $0x78] sm:$0xff] %v689_v13  ;;  %s697_s15 = scalar_lea.vmem %s1278_s11, %s840_s22  }
 0x112 PF: > { %s1353_s23 = sand.u32 15, %s1383_s7   ;;  %s851_s24 = sshll.u32 %s1284_s14, 7 }
 0x113   : > { %s702_s25 = scalar_lea.vmem %s1173_s6, %s851_s24 [#allocation2]   ;;  %s704_s26 = scalar_lea.vmem %s1278_s11, %s851_s24  }
 0x114   : > { %p845_p13 = scmp.le.s32.totalorder %s1353_s23, 0 }
 0x115   : > { %s1022_s27 = smov (!%p845_p13), %s704_s26   ;;  %s1026_s28 = smov (!%p845_p13), %s702_s25  }
 0x116   : > { %795 = sbr.rel (%p845_p13) target bundleno = 291 (0x123), region = 127  ;;  %s1030_s29 = smov (!%p845_p13), 0  }
 0x117   : > { %s1034_s30 = smov (!%p845_p13), 0  }
 0x11b LB: >> { %v714_v30 = vld [vmem:[%s1028_s28] sm:$0xff]  ;;  %s716_s4 = sadd.s32 1, %s1032_s29  ;;  %s708_s30 = sadd.s32 1, %s1036_s30   ;;  %s1036_s30 = sphi %s1034_s30, %s708_s30   ;;  %s1032_s29 = sphi %s1030_s29, %s1031_s29   ;;  %s1028_s28 = sphi %s1026_s28, %s721_s28   ;;  %s1024_s27 = sphi %s1022_s27, %s722_s27  }
 0x11c   : >> { %715 = vst [vmem:[%s1024_s27] sm:$0xff] %v714_v30  ;;  %p717_p0 = scmp.ge.s32.totalorder %s716_s4, %s1353_s23  ;;  %p707_p1 = scmp.ge.s32.totalorder %s708_s30, %s1353_s23 }
 0x11e   : >> { %s1387_s4 = smov (%p717_p0, %s716_s4), 0  ;;  %710 = sbr.rel (!%p707_p1) target bundleno = 283 (0x11b), region = 133 }
 0x11f   : >> { %s846_s5 = sshll.u32 %s1387_s4, 3  ;;  %s1031_s29 = smov %s1387_s4  }
 0x120   : >> { %s721_s28 = scalar_lea.vmem %s702_s25, %s846_s5 [#allocation2]   ;;  %s722_s27 = scalar_lea.vmem %s704_s26, %s846_s5  }
 0x123 PF: > { %p10_p2 = scmp.ge.s32.totalorder %s1076_s16, 5   ;;  %s1379_s12 = smov %s1000_s13 }
 0x124   : > { %s1380_s13 = smov %s1084_s19  ;;  %s1381_s14 = smov %s1076_s16 }
 0x125   :  { %12 = sbr.rel (!%p10_p2) target bundleno = 2 (0x2), region = 144 }

</bundles_post_ra>
